<compile_context>
chip_gen: v5e
topology: v5e:2x2
jax: 0.10.0
libtpu: 0.0.40
codegen_flags: <defaults>
</compile_context>

<pallas_src>
import math
import itertools

import numpy as np
import jax
import jax.numpy as jnp
from jax.experimental import pallas as pl
from jax.experimental.pallas import tpu as pltpu


# ----------------------------------------------------------------------------
# PGA algebra (metric [0, 1, 1, 1]), short-lex blade order (same as
# cliffordlayers' CliffordAlgebra): 16 blades, grades 0..4.
# cayley[i, j, k] = coefficient of e_k in the geometric product e_i * e_j.
# ----------------------------------------------------------------------------
def build_pga_algebra():
    metric = [0.0, 1.0, 1.0, 1.0]
    blades = [()]
    for g in range(1, 5):
        blades += list(itertools.combinations(range(4), g))
    index = {b: i for i, b in enumerate(blades)}
    n = len(blades)
    cayley = np.zeros((n, n, n), dtype=np.float32)
    for i, a in enumerate(blades):
        for j, b in enumerate(blades):
            lst = list(a) + list(b)
            sign = 1.0
            swapped = True
            while swapped:                      # bubble sort, count swaps
                swapped = False
                for t in range(len(lst) - 1):
                    if lst[t] > lst[t + 1]:
                        lst[t], lst[t + 1] = lst[t + 1], lst[t]
                        sign = -sign
                        swapped = True
            out, t = [], 0
            while t < len(lst):                 # cancel squared generators
                if t + 1 < len(lst) and lst[t] == lst[t + 1]:
                    sign *= metric[lst[t]]
                    t += 2
                else:
                    out.append(lst[t])
                    t += 1
            if sign != 0.0:
                cayley[i, j, index[tuple(out)]] += sign
    # reversion sign per blade: (-1)^(g(g-1)/2)
    rev = np.array([(-1.0) ** (len(b) * (len(b) - 1) // 2) for b in blades],
                   dtype=np.float32)
    return jnp.asarray(cayley), jnp.asarray(rev)


def embed(t, blade_idx, n_blades=16):
    """algebra.embed: scatter components into a full 16-blade multivector."""
    out = jnp.zeros(t.shape[:-1] + (n_blades,), dtype=t.dtype)
    return out.at[..., jnp.asarray(blade_idx)].set(t)


def get_clifford_left_kernel(M, w):
    # einsum('ijk, pqi -> jpkq', M, w)  -> (16, O, 16, I), indexed [q, o, r, i]
    return jnp.einsum('ijk,pqi->jpkq', M, w)


def get_clifford_right_kernel(M, w):
    # einsum('ijk, pqk -> jpiq', M, w)  -> (16, O, 16, I), indexed [p, o, q, i]
    return jnp.einsum('ijk,pqk->jpiq', M, w)


ACTION_BLADES = (0, 5, 6, 7, 8, 9, 10, 15)   # scalar, e01,e02,e03, e12,e13,e23, e0123
INPUT_BLADES = (11, 12, 13, 14)              # e012, e013, e023, e123 (PGA points)
E0_BLADE = 14                                # blade overwritten by embed_e0 in forward


# ----------------------------------------------------------------------------
# Parameter-only kernel assembly (run once per parameter update).
#
# Produces:
#   K_full : (I*n_blades, N_pad)  flattened, lane-dense, compute-dtype RHS.
#            The row for the blade-14 position is zero (that x column is
#            discarded by the reference forward); N is padded to a multiple of
#            128 so output stores stay unmasked.
#   bias   : (1, N_pad) f32       contribution of the constant embed_e0 row.
#   O      : out_features
# ----------------------------------------------------------------------------
def assemble_pga_kernel(params, cayley, rev_signs,
                        input_blades=INPUT_BLADES,
                        action_blades=ACTION_BLADES,
                        compute_dtype=jnp.bfloat16):
    weight = params["weight"]          # (O, I)
    action8 = params["_action"]        # (O, I, 8)
    embed_e0 = params["embed_e0"]      # (I, 1)
    O, I = weight.shape
    n_in = len(input_blades)

    k16 = embed(action8, action_blades)                        # (O, I, 16)
    k_rev = rev_signs * k16                                    # algebra.reverse
    k_l = get_clifford_left_kernel(cayley, k16)                # (16,O,16,I)  [q,o,r,i]
    k_r = get_clifford_right_kernel(cayley, k_rev)             # (16,O,16,I)  [p,o,q,i]

    k_r_out = k_r[jnp.asarray(input_blades)]                   # (n_in, O, 16, I)
    k_l_in = k_l[:, :, jnp.asarray(input_blades), :]           # (16, O, n_in, I)

    # Kc[i, r, o, p] — built directly in the transposed, row-major RHS layout.
    Kc = jnp.einsum('oi,poqi,qori->irop', weight, k_r_out, k_l_in)   # (I,n_in,O,n_in)

    # Constant blade-14 row (x[...,14] = embed_e0 in the reference) -> bias.
    k_l_e0 = k_l[:, :, E0_BLADE, :]                            # (16, O, I)
    Kc_e0 = jnp.einsum('oi,poqi,qoi->iop', weight, k_r_out, k_l_e0)  # (I, O, n_in)
    bias = jnp.einsum('i,iop->op', embed_e0[:, 0], Kc_e0).reshape(1, O * n_in)

    if E0_BLADE in input_blades:
        e0_pos = list(input_blades).index(E0_BLADE)
        # That x column is overwritten (discarded) by the forward; zero its row
        # so x can be used as a flat contiguous (B, I*n_in) view.
        Kc = Kc.at[:, e0_pos, :, :].set(0.0)

    K_full = Kc.reshape(I * n_in, O * n_in)
    N = O * n_in
    N_pad = max(128, ((N + 127) // 128) * 128)
    K_full = jnp.pad(K_full, ((0, 0), (0, N_pad - N))).astype(compute_dtype)
    bias = jnp.pad(bias.astype(jnp.float32), ((0, 0), (0, N_pad - N)))
    return K_full, bias, O


# ----------------------------------------------------------------------------
# Pallas streaming matmul + fused bias kernel (the data hot path).
#   out[m, n] = cast( sum_k x[m, k] * K[k, n] + bias[0, n] )
# K and bias are single VMEM-resident blocks; grid iterates batch tiles only.
# ----------------------------------------------------------------------------
def _gemm_bias_kernel(x_ref, k_ref, b_ref, o_ref):
    # Cast activations to the (bf16) compute dtype in VMEM — avoids a separate
    # wrapper-side HBM cast pass while still hitting the bf16-native MXU path.
    xv = x_ref[...].astype(k_ref.dtype)
    acc = jnp.dot(xv, k_ref[...], preferred_element_type=jnp.float32)
    # Store directly in the final output dtype (no post-hoc astype pass).
    o_ref[...] = (acc + b_ref[...]).astype(o_ref.dtype)


def _pick_tm(M, Kd, N_pad, x_bytes, k_bytes, out_bytes,
             vmem_budget=24 * 1024 * 1024):
    """Largest batch tile whose double-buffered working set fits the budget."""
    if M <= 8:
        return M                      # full-dim block (8,128)-rule escape
    fixed = 2 * Kd * N_pad * k_bytes + 2 * N_pad * 4         # resident K + bias
    tm = 8
    for cand in (2048, 1024, 512, 256, 128, 64, 32, 16, 8):
        if cand > M and cand != 8:
            continue
        if fixed + 2 * cand * (Kd * x_bytes + N_pad * out_bytes) <= vmem_budget:
            tm = cand
            break
    # v7x megacore: keep >= 2 parallel batch blocks when the batch allows it.
    while tm > 8 and -(-M // tm) < 2:
        tm //= 2
    return tm


def _pallas_gemm_bias(x, K, bias, out_dtype):
    """x: (M, Kd), K: (Kd, N_pad), bias: (1, N_pad) -> (M_pad, N_pad) out_dtype."""
    M, Kd = x.shape
    Kd2, N_pad = K.shape
    assert Kd == Kd2 and bias.shape == (1, N_pad) and N_pad % 128 == 0

    x_bytes = jnp.dtype(x.dtype).itemsize
    k_bytes = jnp.dtype(K.dtype).itemsize
    out_bytes = jnp.dtype(out_dtype).itemsize
    tm = _pick_tm(M, Kd, N_pad, x_bytes, k_bytes, out_bytes)
    # TODO(synk): add a K-tiled reduction fallback for very large in_features
    # (when the resident (Kd, N_pad) block itself no longer fits in VMEM).

    grid_m = pl.cdiv(M, tm)
    M_pad = grid_m * tm
    x_p = x if M_pad == M else jnp.pad(x, ((0, M_pad - M), (0, 0)))

    flops = 2 * M_pad * N_pad * Kd
    bytes_accessed = (M_pad * Kd * x_bytes + Kd * N_pad * k_bytes
                      + M_pad * N_pad * out_bytes + N_pad * 4)

    return pl.pallas_call(
        _gemm_bias_kernel,
        out_shape=jax.ShapeDtypeStruct((M_pad, N_pad), out_dtype),
        grid_spec=pltpu.PrefetchScalarGridSpec(
            num_scalar_prefetch=0,
            grid=(grid_m,),
            in_specs=[
                pl.BlockSpec((tm, Kd), lambda i: (i, 0)),       # x batch tile
                pl.BlockSpec((Kd, N_pad), lambda i: (0, 0)),    # K: VMEM-resident
                pl.BlockSpec((1, N_pad), lambda i: (0, 0)),     # bias: VMEM-resident
            ],
            out_specs=pl.BlockSpec((tm, N_pad), lambda i: (i, 0)),
        ),
        compiler_params=pltpu.CompilerParams(
            dimension_semantics=("parallel",),
            vmem_limit_bytes=32 * 1024 * 1024),
        cost_estimate=pl.CostEstimate(flops=int(flops), transcendentals=0,
                                      bytes_accessed=int(bytes_accessed)),
    )(x_p, K, bias)


# ----------------------------------------------------------------------------
# Data-path forward (call with a pre-assembled K_full / bias).
# ----------------------------------------------------------------------------
def pga_apply(x, K_full, bias, out_features):
    """x: (B, I, n_blades) -> (B, out_features, n_blades)."""
    B, I, nb = x.shape
    N = out_features * nb
    Kd, N_pad = K_full.shape
    assert Kd == I * nb and N <= N_pad

    # Free, contiguous view — no blade gather, no HBM copy of the activation.
    x_flat = x.reshape(B, Kd)

    out_p = _pallas_gemm_bias(x_flat, K_full, bias, out_dtype=x.dtype)
    out = out_p[:B, :N] if (out_p.shape[0] != B or N_pad != N) else out_p
    return out.reshape(B, out_features, nb)


def pga_conjugate_linear_forward(x, params, cayley, rev_signs,
                                 input_blades=INPUT_BLADES,
                                 action_blades=ACTION_BLADES,
                                 compute_dtype=jnp.bfloat16):
    """Convenience wrapper (assembly + apply). Prefer hoisting the assembly."""
    K_full, bias, O = assemble_pga_kernel(params, cayley, rev_signs,
                                          input_blades, action_blades,
                                          compute_dtype)
    return pga_apply(x, K_full, bias, O)


# ----------------------------------------------------------------------------
# Deterministic parameter construction (mirrors reset_parameters()).
# ----------------------------------------------------------------------------
def init_params(key, in_features, out_features):
    k1, k2, k3 = jax.random.split(key, 3)
    O, I = out_features, in_features
    scalar = jax.random.uniform(k1, (O, I), minval=-1.0, maxval=1.0)
    rot = jax.random.uniform(k2, (O, I, 3), minval=-1.0, maxval=1.0)
    action8 = jnp.zeros((O, I, 8), jnp.float32)
    action8 = action8.at[..., 0].set(scalar).at[..., 4:7].set(rot)
    # unit-rotor normalization: for this init (scalar + e12/e13/e23 only) the
    # PGA norm is sqrt(s^2 + |b|^2) and all non-scalar components vanish.
    norm = jnp.sqrt(scalar ** 2 + jnp.sum(rot ** 2, axis=-1))
    action8 = action8 / norm[..., None]
    # kaiming_uniform_(a=sqrt(5)) on (O, I)  ->  U(-1/sqrt(I), 1/sqrt(I))
    bound = 1.0 / math.sqrt(I)
    weight = jax.random.uniform(k3, (O, I), minval=-bound, maxval=bound)
    embed_e0 = jnp.zeros((I, 1), jnp.float32)   # module default: zeros
    return {"_action": action8, "weight": weight, "embed_e0": embed_e0}


if __name__ == "__main__":
    B, in_features, out_features = 8, 8, 8
    cayley, rev_signs = build_pga_algebra()

    key = jax.random.PRNGKey(0)
    kp, kx, ke = jax.random.split(key, 3)
    params = init_params(kp, in_features, out_features)
    # use a nonzero embed_e0 so the fused bias path is actually exercised
    params["embed_e0"] = jax.random.normal(ke, (in_features, 1), jnp.float32)
    x = jax.random.normal(kx, (B, in_features, len(INPUT_BLADES)), jnp.float32)

    # pure-JAX reference of the original dense einsum formulation
    k16 = embed(params["_action"], ACTION_BLADES)
    k_rev = rev_signs * k16
    x16 = embed(x, INPUT_BLADES)
    x16 = x16.at[..., 14].set(jnp.broadcast_to(params["embed_e0"][:, 0],
                                               (B, in_features)))
    k_l = get_clifford_left_kernel(cayley, k16)
    k_r = get_clifford_right_kernel(cayley, k_rev)
    ref = jnp.einsum('oi,poqi,qori,bir->bop', params["weight"], k_r, k_l, x16)
    ref = ref[..., jnp.asarray(INPUT_BLADES)]

    # --- f32 compute path: tight correctness check ---
    K32, b32, O = assemble_pga_kernel(params, cayley, rev_signs,
                                      compute_dtype=jnp.float32)
    out32 = jax.block_until_ready(pga_apply(x, K32, b32, O))
    assert out32.shape == (B, out_features, len(INPUT_BLADES))
    if not jnp.allclose(out32, ref, atol=2e-3, rtol=2e-3):
        raise AssertionError("Pallas kernel (f32) mismatch vs reference einsum")

    # --- default bf16 fast path (bf16 operands, f32 accumulation): loose check ---
    Kbf, bbf, O = assemble_pga_kernel(params, cayley, rev_signs)
    outbf = jax.block_until_ready(pga_apply(x, Kbf, bbf, O))
    assert outbf.shape == (B, out_features, len(INPUT_BLADES))
    if not jnp.allclose(outbf.astype(jnp.float32), ref, atol=0.15, rtol=0.15):
        raise AssertionError("Pallas kernel (bf16) mismatch vs reference einsum")

    print("KERNEL_OK")
</pallas_src>

<mosaic_0001>
module attributes {stable_mosaic.version = 11 : i64} {
  func.func @_gemm_bias_kernel(%arg0: i32, %arg1: memref<8x32xf32, #tpu.memory_space<vmem>>, %arg2: memref<32x128xf32, #tpu.memory_space<vmem>>, %arg3: memref<1x128xf32, #tpu.memory_space<vmem>>, %arg4: memref<8x128xf32, #tpu.memory_space<vmem>>) attributes {dimension_semantics = [#tpu.dimension_semantics<parallel>], iteration_bounds = array<i64: 1>, scalar_prefetch = 0 : i64, scratch_operands = 0 : i64, tpu.core_type = #tpu.core_type<tc>, window_params = [{transform_indices = @transform_0, window_bounds = array<i64: 8, 32>}, {pipeline_mode = #tpu.pipeline_mode<synchronous>, transform_indices = @transform_1, window_bounds = array<i64: 32, 128>}, {pipeline_mode = #tpu.pipeline_mode<synchronous>, transform_indices = @transform_2, window_bounds = array<i64: 1, 128>}, {transform_indices = @transform_3, window_bounds = array<i64: 8, 128>}]} {
    %c0 = arith.constant 0 : index
    %c0_0 = arith.constant 0 : index
    %0 = vector.load %arg1[%c0, %c0_0] : memref<8x32xf32, #tpu.memory_space<vmem>>, vector<8x32xf32>
    %c0_1 = arith.constant 0 : index
    %c0_2 = arith.constant 0 : index
    %1 = vector.load %arg2[%c0_1, %c0_2] : memref<32x128xf32, #tpu.memory_space<vmem>>, vector<32x128xf32>
    %cst = arith.constant dense<0.000000e+00> : vector<8x128xf32>
    %2 = tpu.matmul %0, %1, %cst {dimension_numbers = #tpu.dot_dimension_numbers<[1], [0], [0], [1], [0, 0, 1, 1], [], []>} : vector<8x32xf32>, vector<32x128xf32>, vector<8x128xf32> -> vector<8x128xf32>
    %c0_3 = arith.constant 0 : index
    %c0_4 = arith.constant 0 : index
    %3 = vector.load %arg3[%c0_3, %c0_4] : memref<1x128xf32, #tpu.memory_space<vmem>>, vector<1x128xf32>
    %4 = vector.broadcast %3 : vector<1x128xf32> to vector<8x128xf32>
    %5 = arith.addf %2, %4 : vector<8x128xf32>
    %c0_5 = arith.constant 0 : index
    %c0_6 = arith.constant 0 : index
    %6 = vector.load %arg4[%c0_5, %c0_6] : memref<8x128xf32, #tpu.memory_space<vmem>>, vector<8x128xf32>
    tpu.vector_store %arg4[%c0_5, %c0_6], %5 {strides = array<i32>} : memref<8x128xf32, #tpu.memory_space<vmem>>, vector<8x128xf32>,
    return
  }
  func.func @transform_0(%arg0: i32) -> (i32, i32) {
    %c0_i32 = arith.constant 0 : i32
    %c0_i32_0 = arith.constant 0 : i32
    return %arg0, %c0_i32 : i32, i32
  }
  func.func @transform_1(%arg0: i32) -> (i32, i32) {
    %c0_i32 = arith.constant 0 : i32
    %c0_i32_0 = arith.constant 0 : i32
    %c0_i32_1 = arith.constant 0 : i32
    return %c0_i32, %c0_i32_0 : i32, i32
  }
  func.func @transform_2(%arg0: i32) -> (i32, i32) {
    %c0_i32 = arith.constant 0 : i32
    %c0_i32_0 = arith.constant 0 : i32
    %c0_i32_1 = arith.constant 0 : i32
    return %c0_i32, %c0_i32_0 : i32, i32
  }
  func.func @transform_3(%arg0: i32) -> (i32, i32) {
    %c0_i32 = arith.constant 0 : i32
    %c0_i32_0 = arith.constant 0 : i32
    return %arg0, %c0_i32 : i32, i32
  }
}

</mosaic_0001>

<bundles_post_ra>
// kernel: tpu_custom_call.1
= control target key start
LH: loop header
LB: loop body
LE: loop exit
PB: predicated region body
PF: predicated region fallthrough
CT: control target
= control target key end

     0   :  { %8 = vsyncpa [#allocation3], 0  ;;  %s219_s0 = inlined_call_operand.hbm [shape: f32[8,32], index: 0, kind: input, shape index: {}]   ;;  %s220_s1 = inlined_call_operand.hbm [shape: f32[32,128], index: 1, kind: input, shape index: {}]   ;;  %s221_s2 = inlined_call_operand.vmem [shape: f32[1,128], index: 2, kind: input, shape index: {}]   ;;  %s222_s3 = inlined_call_operand.hbm [shape: f32[8,128], index: 3, kind: output, shape index: {}]  }
   0x1   :  { %9 = vsyncpa [#allocation6], 0 }
   0x2   :  { %10 = vsyncpa [#allocation4], 0  ;;  %s16_s14 = sshll.u32 %s219_s0, 4  ;;  %s182_s15 = smov [#allocation2]   ;;  %s17_s14 = int_to_ptr.hbm [resolvable:$true] %s16_s14 }
   0x3   :  { %s18_s16 = sshll.u32 %s182_s15, 4  ;;  %s26_s19 = sshll.u32 %s220_s1, 4  ;;  %s19_s16 = int_to_ptr.vmem [resolvable:$true] %s18_s16  ;;  %s27_s19 = int_to_ptr.hbm [resolvable:$true] %s26_s19 }
   0x4   :  { %21 = dma.hbm_to_vmem [thread:$0]  %s17_s14, 128, %s19_s16, [#allocation3]  }
   0x5   :  { %s183_s20 = smov [#allocation5]   ;;  %s184_s22 = smov 128  }
   0x6   :  { %s28_s21 = sshll.u32 %s183_s20, 4  ;;  %s185_s23 = smov 8   ;;  %s29_s21 = int_to_ptr.vmem [resolvable:$true] %s28_s21 }
   0x7   :  { %34 = dma.hbm_to_vmem [thread:$0]  %s27_s19, 512, %s29_s21, [#allocation6], %s184_s22, %s184_s22, %s185_s23  }
   0x8   :  { %176 = dma.done.wait [#allocation3], 128  }
   0x9   :  { %177 = vsyncadd [#allocation3], 4294967168 }
   0xa   :  { %178 = dma.done.wait [#allocation6], 512  }
   0xb   :  { %179 = vsyncadd [#allocation6], 4294966784  ;;  %v49_v0 = vld [vmem:[#allocation5 + $0x18] sm:$0xff]  ;;  %v48_v1 = vld [vmem:[#allocation5 + $0x10] sm:$0xff]  ;;  %vm54_vm0 = vcmask 261120   ;;  %s186_s24 = smov [#allocation7]  }
   0xc   :  { %70 = vmatpush.msra.mxu0 %v49_v0  ;;  %v47_v2 = vld [vmem:[#allocation5 + $0x8] sm:$0xff]  ;;  %v46_v3 = vld [vmem:[#allocation5] sm:$0xff]  ;;  %v45_v4 = vld [vmem:[#allocation2] sm:$0xff]  ;;  %s84_s25 = sshll.u32 %s186_s24, 4  ;;  %s86_s28 = sshll.u32 %s222_s3, 4  ;;  %s85_s25 = int_to_ptr.vmem [resolvable:$true] %s84_s25  ;;  %s87_s28 = int_to_ptr.hbm [resolvable:$true] %s86_s28 }
   0xd   :  { %v103_v5 = vld [vmem:[%s221_s2] ss:$0 sm:$0xff] }
   0xe   :  { %71 = vmatpush.msra.mxu0 %v48_v1 }
  0x10   :  { %72 = vmatpush.msra.mxu0 %v47_v2 }
  0x12   :  { %73 = vmatpush.msra.mxu0 %v46_v3 }
  0x13   :  { %97 = vmatmul.msk.f32.vlgmr.msra.gmra.mxu0 %vm54_vm0, %v45_v4 }
  0x90   :  { %v75_v6 = vpop.f32.mrf.mxu0 }
  0x91   :  { %v76_v7 = vadd.f32 %v103_v5, %v75_v6 }
  0x93   :  { %78 = vst [vmem:[#allocation7] sm:$0xff] %v76_v7 }
  0x94   :  { %89 = dma.vmem_to_hbm [thread:$0]  %s85_s25, 128, %s87_s28, [#allocation4]  }
  0x95   :  { %180 = dma.done.wait [#allocation4], 128  }
  0x96   :  { %181 = vsyncadd [#allocation4], 4294967168 }
  0x97   :  { %94 = vsyncpa [#allocation3], 1 }
  0x98   :  { %95 = vsyncpa [#allocation6], 1 }
  0x99   :  { %96 = vsyncpa [#allocation4], 1 }

</bundles_post_ra>
